<compile_context>
chip_gen: v7x
topology: tpu7x:2x2x1
jax: 0.10.0
libtpu: 0.0.40
codegen_flags: <defaults>
</compile_context>

<pallas_src>
import math
from functools import partial

import jax
import jax.numpy as jnp
from jax.experimental import pallas as pl
from jax.experimental.pallas import tpu as pltpu


# ---------------------------------------------------------------------------
# Kernel 1: fused QKV linear (fast_qkv):
#   q = (x @ Wq + q_bias) / sqrt(head_dim);  k = x @ Wk;  v = x @ Wv + v_bias
# ---------------------------------------------------------------------------
def _qkv_kernel(x_ref, w_ref, qb_ref, vb_ref, q_ref, k_ref, v_ref, *, scale):
    x = x_ref[...].astype(jnp.bfloat16)               # bf16 MXU operand
    H = q_ref.shape[-1]
    # Three dots against static lane-slices of (bf16) W: identical MXU work, but
    # the live f32 intermediate is (tm, H) instead of (tm, 3H).
    q = jnp.dot(x, w_ref[:, :H], preferred_element_type=jnp.float32)
    q_ref[...] = ((q + qb_ref[...]) * scale).astype(q_ref.dtype)   # fold bias+scale
    k = jnp.dot(x, w_ref[:, H:2 * H], preferred_element_type=jnp.float32)
    k_ref[...] = k.astype(k_ref.dtype)
    v = jnp.dot(x, w_ref[:, 2 * H:], preferred_element_type=jnp.float32)
    v_ref[...] = (v + vb_ref[...]).astype(v_ref.dtype)


def _pick_row_tile(m):
    # Largest row tile (multiple of 8) that divides M, capped at 256: with bf16 W
    # single-buffered + bf16 q/k/v outputs the per-step working set stays well
    # inside the default scoped-VMEM limit on v5e (16 MiB) and v7x (32 MiB) even
    # at H=1024, with no vmem_limit_bytes override needed.
    for tm in (256, 128, 64, 32, 16, 8):
        if m % tm == 0:
            return tm
    return m


def qkv_projection(hidden_states, w_qkv_bf16, q_bias, v_bias, scale):
    B, S, H = hidden_states.shape
    M = B * S
    tm = _pick_row_tile(M)
    x2d = hidden_states.reshape(M, H)
    # bf16 intermediates: kernel 2 downcasts to bf16 before its dots anyway;
    # this halves kernel-1 writeback and kernel-2 Q/K/V read traffic.
    out_sds = jax.ShapeDtypeStruct((M, H), jnp.bfloat16)

    row_spec = pl.BlockSpec((tm, H), lambda i: (i, 0))
    # Resident blocks (constant index_map): single-buffer so the pipeline does not
    # allocate a useless second copy of the (H, 3H) weight.
    w_spec = pl.BlockSpec((H, 3 * H), lambda i: (0, 0), pipeline_mode=pl.Buffered(1))
    b_spec = pl.BlockSpec((1, H), lambda i: (0, 0), pipeline_mode=pl.Buffered(1))

    q, k, v = pl.pallas_call(
        partial(_qkv_kernel, scale=scale),
        grid=(M // tm,),
        in_specs=[row_spec, w_spec, b_spec, b_spec],
        out_specs=(row_spec, row_spec, row_spec),
        out_shape=(out_sds, out_sds, out_sds),
        compiler_params=pltpu.CompilerParams(
            dimension_semantics=("parallel",)),
    )(x2d, w_qkv_bf16, q_bias.reshape(1, H), v_bias.reshape(1, H))
    return (q.reshape(B, S, H), k.reshape(B, S, H), v.reshape(B, S, H))


# ---------------------------------------------------------------------------
# Kernel 2: per-(batch, head-group) attention, Q/K/V/ctx in (B, S, H) layout.
# Mask is already folded into `bias_ref` (large negative fill) by the wrapper.
# ---------------------------------------------------------------------------
def _attn_kernel(q_ref, k_ref, v_ref, bias_ref, o_ref, *, group, head_dim):
    ctx_tiles = []
    for g in range(group):                            # small static head loop (G<=~8)
        lo = g * head_dim
        hi = lo + head_dim
        qg = q_ref[0, :, lo:hi].astype(jnp.bfloat16)  # (S, D), already scaled, bf16
        kg = k_ref[0, :, lo:hi].astype(jnp.bfloat16)  # (S, D)
        vg = v_ref[0, :, lo:hi].astype(jnp.bfloat16)  # (S, D)

        # QK^T with K consumed in its natural (S, D) layout (contract last dims).
        scores = jax.lax.dot_general(
            qg, kg, (((1,), (1,)), ((), ())),
            preferred_element_type=jnp.float32)       # (S, S) f32
        # rel_pos + rel_2d_pos + mask fill, pre-summed in the wrapper (bf16 stream).
        scores = scores + bias_ref[0, g].astype(jnp.float32)

        # float32 softmax (matches F.softmax(..., dtype=torch.float32)).
        m = jnp.max(scores, axis=-1, keepdims=True)
        p = jnp.exp(scores - m)
        denom = jnp.sum(p, axis=-1, keepdims=True)
        probs = p * pl.reciprocal(denom, approx=True)
        # dropout: eval mode -> identity

        ctx_tiles.append(jnp.dot(probs.astype(jnp.bfloat16), vg,
                                 preferred_element_type=jnp.float32))   # (S, D) f32

    # Single lane-dense store of the full (S, Hg) slab instead of G sub-128-lane
    # masked stores (per-head slab writes lower to vst.msk partial stores).
    o_ref[0, :, :] = jnp.concatenate(ctx_tiles, axis=-1).astype(o_ref.dtype)


def _pick_head_group(num_heads, head_dim):
    # Smallest divisor of num_heads whose channel width reaches 128 lanes
    # (e.g. G=2 for head_dim=64).
    for g in range(1, num_heads + 1):
        if num_heads % g == 0 and g * head_dim >= 128:
            return g
    # Fallback (small configs): largest divisor <= 8 so the unrolled per-head
    # live ranges stay bounded while keeping the channel block as wide as possible.
    for g in range(min(num_heads, 8), 0, -1):
        if num_heads % g == 0:
            return g
    return num_heads


def attention(q, k, v, bias, num_heads, head_dim):
    B, S, H = q.shape
    G = _pick_head_group(num_heads, head_dim)
    n_groups = num_heads // G
    Hg = G * head_dim

    ch_spec = pl.BlockSpec((1, S, Hg), lambda b, hg: (b, 0, hg))
    bias_spec = pl.BlockSpec((1, G, S, S), lambda b, hg: (b, hg, 0, 0))

    return pl.pallas_call(
        partial(_attn_kernel, group=G, head_dim=head_dim),
        grid=(B, n_groups),   # both axes parallel -> shards across v7x's 2 TCs
        in_specs=[ch_spec, ch_spec, ch_spec, bias_spec],
        out_specs=ch_spec,
        out_shape=jax.ShapeDtypeStruct((B, S, H), jnp.float32),
        compiler_params=pltpu.CompilerParams(
            dimension_semantics=("parallel", "parallel")),
    )(q, k, v, bias)


# ---------------------------------------------------------------------------
# Module-level wrapper
# ---------------------------------------------------------------------------
def layoutlmv2_self_attention(hidden_states, attention_mask, rel_pos, rel_2d_pos,
                              params, num_heads):
    B, S, H = hidden_states.shape
    head_dim = H // num_heads
    scale = 1.0 / math.sqrt(head_dim)

    # bf16 weights: feeds the MXU at bf16 rate and halves the resident-W
    # footprint and its one-time DMA.
    w_bf16 = params["w_qkv"].astype(jnp.bfloat16)
    q, k, v = qkv_projection(hidden_states, w_bf16,
                             params["q_bias"], params["v_bias"], scale)

    # rel_pos / rel_2d_pos are layer-invariant: pre-sum once and fold in the key
    # mask as a large finite negative (-1e9, representable in bf16) so the kernel
    # needs no mask input or (S, S) select.  Note: fully-masked rows yield ~uniform
    # probs instead of NaN (the torch reference produces NaN there).
    mask_fill = jnp.where(attention_mask.astype(bool),
                          jnp.float32(-1e9), jnp.float32(0.0))
    bias = (rel_pos + rel_2d_pos + mask_fill).astype(jnp.bfloat16)

    # TODO(synk): fuse QKV projection and attention into a single pallas_call so
    # q/k/v never round-trip HBM (next-largest bandwidth win, bigger refactor).
    return attention(q, k, v, bias, num_heads, head_dim)


# ---------------------------------------------------------------------------
# Pure-JAX f32 reference (mirrors the PyTorch forward) for correctness checking
# ---------------------------------------------------------------------------
def _reference(hidden_states, attention_mask, rel_pos, rel_2d_pos, params, num_heads):
    B, S, H = hidden_states.shape
    D = H // num_heads
    qkv = hidden_states @ params["w_qkv"]
    q, k, v = jnp.split(qkv, 3, axis=-1)
    q = q + params["q_bias"]
    v = v + params["v_bias"]

    def t(x):
        return x.reshape(B, S, num_heads, D).transpose(0, 2, 1, 3)

    ql, kl, vl = t(q), t(k), t(v)
    ql = ql / math.sqrt(D)
    scores = jnp.einsum("bhqd,bhkd->bhqk", ql, kl)
    scores = scores + rel_pos + rel_2d_pos
    scores = jnp.where(attention_mask.astype(bool), -jnp.inf, scores)
    probs = jax.nn.softmax(scores.astype(jnp.float32), axis=-1)
    ctx = jnp.einsum("bhqk,bhkd->bhqd", probs, vl)
    return ctx.transpose(0, 2, 1, 3).reshape(B, S, H)


if __name__ == "__main__":
    # config: hidden=32, heads=4 (head_dim=8), seq=16, batch=2, fast_qkv=True
    B, S, HIDDEN, NUM_HEADS = 2, 16, 32, 4

    key = jax.random.PRNGKey(0)
    k1, k2, k3, k4, k5, k6 = jax.random.split(key, 6)

    hidden_states = jax.random.normal(k1, (B, S, HIDDEN), dtype=jnp.float32)
    # params (deterministic, synthetic). Module init has q_bias/v_bias = zeros;
    # use small random values here to exercise the bias path.
    params = {
        "w_qkv": jax.random.normal(k2, (HIDDEN, 3 * HIDDEN), dtype=jnp.float32) * 0.05,
        "q_bias": jax.random.normal(k3, (1, 1, HIDDEN), dtype=jnp.float32) * 0.1,
        "v_bias": jax.random.normal(k4, (1, 1, HIDDEN), dtype=jnp.float32) * 0.1,
    }
    rel_pos = jax.random.normal(k5, (B, NUM_HEADS, S, S), dtype=jnp.float32) * 0.1
    rel_2d_pos = jax.random.normal(k6, (B, NUM_HEADS, S, S), dtype=jnp.float32) * 0.1
    # attention_mask: nonzero == masked (matches masked_fill_(mask.bool(), -inf));
    # mask out the last 3 key positions of batch 1.
    attention_mask = jnp.zeros((B, 1, 1, S), dtype=jnp.int32)
    attention_mask = attention_mask.at[1, 0, 0, S - 3:].set(1)

    out = layoutlmv2_self_attention(hidden_states, attention_mask, rel_pos,
                                    rel_2d_pos, params, NUM_HEADS)
    out = jax.block_until_ready(out)

    ref = _reference(hidden_states, attention_mask, rel_pos, rel_2d_pos,
                     params, NUM_HEADS)
    assert out.shape == (B, S, HIDDEN)
    # bf16 weights/intermediates/bias + approx reciprocal -> mixed-precision tol
    assert jnp.allclose(out, ref, atol=2e-2, rtol=2e-2), "mismatch vs reference"

    print("KERNEL_OK")
</pallas_src>

<mosaic_0001>
module attributes {stable_mosaic.version = 11 : i64} {
  func.func @_qkv_kernel(%arg0: i32, %arg1: memref<32x32xf32, #tpu.memory_space<vmem>>, %arg2: memref<32x96xbf16, #tpu.memory_space<vmem>>, %arg3: memref<1x32xf32, #tpu.memory_space<vmem>>, %arg4: memref<1x32xf32, #tpu.memory_space<vmem>>, %arg5: memref<32x32xbf16, #tpu.memory_space<vmem>>, %arg6: memref<32x32xbf16, #tpu.memory_space<vmem>>, %arg7: memref<32x32xbf16, #tpu.memory_space<vmem>>) attributes {dimension_semantics = [#tpu.dimension_semantics<parallel>], iteration_bounds = array<i64: 1>, scalar_prefetch = 0 : i64, scratch_operands = 0 : i64, tpu.core_type = #tpu.core_type<tc>, window_params = [{transform_indices = @transform_0, window_bounds = array<i64: 32, 32>}, {pipeline_mode = #tpu.pipeline_mode<synchronous>, transform_indices = @transform_1, window_bounds = array<i64: 32, 96>}, {pipeline_mode = #tpu.pipeline_mode<synchronous>, transform_indices = @transform_2, window_bounds = array<i64: 1, 32>}, {pipeline_mode = #tpu.pipeline_mode<synchronous>, transform_indices = @transform_3, window_bounds = array<i64: 1, 32>}, {transform_indices = @transform_4, window_bounds = array<i64: 32, 32>}, {transform_indices = @transform_5, window_bounds = array<i64: 32, 32>}, {transform_indices = @transform_6, window_bounds = array<i64: 32, 32>}]} {
    %c0 = arith.constant 0 : index
    %c0_0 = arith.constant 0 : index
    %0 = vector.load %arg1[%c0, %c0_0] : memref<32x32xf32, #tpu.memory_space<vmem>>, vector<32x32xf32>
    %1 = arith.truncf %0 : vector<32x32xf32> to vector<32x32xbf16>
    %c0_1 = arith.constant 0 : index
    %c0_2 = arith.constant 0 : index
    %2 = vector.load %arg2[%c0_1, %c0_2] : memref<32x96xbf16, #tpu.memory_space<vmem>>, vector<32x32xbf16>
    %cst = arith.constant dense<0.000000e+00> : vector<32x32xf32>
    %3 = tpu.matmul %1, %2, %cst {dimension_numbers = #tpu.dot_dimension_numbers<[1], [0], [0], [1], [0, 0, 1, 1], [], []>} : vector<32x32xbf16>, vector<32x32xbf16>, vector<32x32xf32> -> vector<32x32xf32>
    %c0_3 = arith.constant 0 : index
    %c0_4 = arith.constant 0 : index
    %4 = vector.load %arg3[%c0_3, %c0_4] : memref<1x32xf32, #tpu.memory_space<vmem>>, vector<1x32xf32>
    %5 = vector.broadcast %4 : vector<1x32xf32> to vector<32x32xf32>
    %6 = arith.addf %3, %5 : vector<32x32xf32>
    %cst_5 = arith.constant 0.353553385 : f32
    %7 = vector.broadcast %cst_5 : f32 to vector<32x32xf32>
    %8 = arith.mulf %6, %7 : vector<32x32xf32>
    %9 = arith.truncf %8 : vector<32x32xf32> to vector<32x32xbf16>
    %c0_6 = arith.constant 0 : index
    %c0_7 = arith.constant 0 : index
    %10 = vector.load %arg5[%c0_6, %c0_7] : memref<32x32xbf16, #tpu.memory_space<vmem>>, vector<32x32xbf16>
    tpu.vector_store %arg5[%c0_6, %c0_7], %9 {strides = array<i32>} : memref<32x32xbf16, #tpu.memory_space<vmem>>, vector<32x32xbf16>,
    %c0_8 = arith.constant 0 : index
    %c32 = arith.constant 32 : index
    %11 = vector.load %arg2[%c0_8, %c32] : memref<32x96xbf16, #tpu.memory_space<vmem>>, vector<32x32xbf16>
    %cst_9 = arith.constant dense<0.000000e+00> : vector<32x32xf32>
    %12 = tpu.matmul %1, %11, %cst_9 {dimension_numbers = #tpu.dot_dimension_numbers<[1], [0], [0], [1], [0, 0, 1, 1], [], []>} : vector<32x32xbf16>, vector<32x32xbf16>, vector<32x32xf32> -> vector<32x32xf32>
    %13 = arith.truncf %12 : vector<32x32xf32> to vector<32x32xbf16>
    %c0_10 = arith.constant 0 : index
    %c0_11 = arith.constant 0 : index
    %14 = vector.load %arg6[%c0_10, %c0_11] : memref<32x32xbf16, #tpu.memory_space<vmem>>, vector<32x32xbf16>
    tpu.vector_store %arg6[%c0_10, %c0_11], %13 {strides = array<i32>} : memref<32x32xbf16, #tpu.memory_space<vmem>>, vector<32x32xbf16>,
    %c0_12 = arith.constant 0 : index
    %c64 = arith.constant 64 : index
    %15 = vector.load %arg2[%c0_12, %c64] : memref<32x96xbf16, #tpu.memory_space<vmem>>, vector<32x32xbf16>
    %cst_13 = arith.constant dense<0.000000e+00> : vector<32x32xf32>
    %16 = tpu.matmul %1, %15, %cst_13 {dimension_numbers = #tpu.dot_dimension_numbers<[1], [0], [0], [1], [0, 0, 1, 1], [], []>} : vector<32x32xbf16>, vector<32x32xbf16>, vector<32x32xf32> -> vector<32x32xf32>
    %c0_14 = arith.constant 0 : index
    %c0_15 = arith.constant 0 : index
    %17 = vector.load %arg4[%c0_14, %c0_15] : memref<1x32xf32, #tpu.memory_space<vmem>>, vector<1x32xf32>
    %18 = vector.broadcast %17 : vector<1x32xf32> to vector<32x32xf32>
    %19 = arith.addf %16, %18 : vector<32x32xf32>
    %20 = arith.truncf %19 : vector<32x32xf32> to vector<32x32xbf16>
    %c0_16 = arith.constant 0 : index
    %c0_17 = arith.constant 0 : index
    %21 = vector.load %arg7[%c0_16, %c0_17] : memref<32x32xbf16, #tpu.memory_space<vmem>>, vector<32x32xbf16>
    tpu.vector_store %arg7[%c0_16, %c0_17], %20 {strides = array<i32>} : memref<32x32xbf16, #tpu.memory_space<vmem>>, vector<32x32xbf16>,
    return
  }
  func.func @transform_0(%arg0: i32) -> (i32, i32) {
    %c0_i32 = arith.constant 0 : i32
    %c0_i32_0 = arith.constant 0 : i32
    return %arg0, %c0_i32 : i32, i32
  }
  func.func @transform_1(%arg0: i32) -> (i32, i32) {
    %c0_i32 = arith.constant 0 : i32
    %c0_i32_0 = arith.constant 0 : i32
    %c0_i32_1 = arith.constant 0 : i32
    return %c0_i32, %c0_i32_0 : i32, i32
  }
  func.func @transform_2(%arg0: i32) -> (i32, i32) {
    %c0_i32 = arith.constant 0 : i32
    %c0_i32_0 = arith.constant 0 : i32
    %c0_i32_1 = arith.constant 0 : i32
    return %c0_i32, %c0_i32_0 : i32, i32
  }
  func.func @transform_3(%arg0: i32) -> (i32, i32) {
    %c0_i32 = arith.constant 0 : i32
    %c0_i32_0 = arith.constant 0 : i32
    %c0_i32_1 = arith.constant 0 : i32
    return %c0_i32, %c0_i32_0 : i32, i32
  }
  func.func @transform_4(%arg0: i32) -> (i32, i32) {
    %c0_i32 = arith.constant 0 : i32
    %c0_i32_0 = arith.constant 0 : i32
    return %arg0, %c0_i32 : i32, i32
  }
  func.func @transform_5(%arg0: i32) -> (i32, i32) {
    %c0_i32 = arith.constant 0 : i32
    %c0_i32_0 = arith.constant 0 : i32
    return %arg0, %c0_i32 : i32, i32
  }
  func.func @transform_6(%arg0: i32) -> (i32, i32) {
    %c0_i32 = arith.constant 0 : i32
    %c0_i32_0 = arith.constant 0 : i32
    return %arg0, %c0_i32 : i32, i32
  }
}

</mosaic_0001>

<bundles_post_ra>
// kernel: tpu_custom_call.1
= control target key start
LH: loop header
LB: loop body
LE: loop exit
PB: predicated region body
PF: predicated region fallthrough
CT: control target
= control target key end

     0   :  { %12 = vsyncpa [#allocation3], 0  ;;  %s753_s0 = inlined_call_operand.hbm [shape: f32[32,32], index: 0, kind: input, shape index: {}]   ;;  %s754_s1 = inlined_call_operand.hbm [shape: bf16[32,96], index: 1, kind: input, shape index: {}]   ;;  %s755_s2 = inlined_call_operand.vmem [shape: f32[1,32], index: 2, kind: input, shape index: {}]   ;;  %s756_s3 = inlined_call_operand.vmem [shape: f32[1,32], index: 3, kind: input, shape index: {}]   ;;  %s757_s4 = inlined_call_operand.hbm [shape: bf16[32,32], index: 4, kind: output, shape index: {0}]   ;;  %s758_s5 = inlined_call_operand.hbm [shape: bf16[32,32], index: 5, kind: output, shape index: {1}]   ;;  %s759_s6 = inlined_call_operand.hbm [shape: bf16[32,32], index: 6, kind: output, shape index: {2}]  }
   0x1   :  { %13 = vsyncpa [#allocation6], 0 }
   0x2   :  { %14 = vsyncpa [#allocation4], 0 }
   0x3   :  { %15 = vsyncpa [#allocation9], 0  ;;  %s603_s21 = smov [#allocation2]   ;;  %s485_s25 = scalar_lea.hbm %s753_s0, 512 }
   0x4   :  { %s21_s22 = sshll.u32 %s603_s21, 4  ;;  %p486_p0 = scmp.ne.s32.totalorder %s753_s0, %s485_s25  ;;  %s22_s22 = int_to_ptr.vmem [resolvable:$true] %s21_s22 }
   0x5   :  { %p489_p1 = scmp.lt.u32.totalorder %s485_s25, %s753_s0 }
   0x7   :  { %p491_p2 = pnand %p489_p1, %p486_p0 }
   0x9   :  { %494 = shalt.err (!%p491_p2)
}
   0xa   :  { %s495_s30 = scalar_lea.vmem %s22_s22, 512  ;;  %p500_p4 = scmp.lt.s32.totalorder %s22_s22, %s22_s22 }
   0xb   :  { %p496_p3 = scmp.ne.s32.totalorder %s22_s22, %s495_s30  ;;  %p501_p5 = scmp.lt.s32.totalorder %s495_s30, %s495_s30 }
   0xd   :  { %p502_p6 = por %p501_p5, %p500_p4 }
   0xf   :  { %p503_p7 = pnand %p502_p6, %p496_p3 }
  0x11   :  { %506 = shalt.err (!%p503_p7)
}
  0x12   :  { %s604_s7 = smov 128   ;;  %s605_s8 = smov 8  }
  0x13   :  { %27 = dma.hbm_to_vmem [thread:$0]  %s753_s0, 512, %s22_s22, [#allocation3], %s604_s7, %s604_s7, %s605_s8  }
  0x14   :  { %s606_s11 = smov [#allocation5]   ;;  %s507_s15 = scalar_lea.hbm %s754_s1, 256 }
  0x15   :  { %s33_s12 = sshll.u32 %s606_s11, 4  ;;  %p508_p8 = scmp.ne.s32.totalorder %s754_s1, %s507_s15  ;;  %s34_s12 = int_to_ptr.vmem [resolvable:$true] %s33_s12 }
  0x16   :  { %p511_p9 = scmp.lt.u32.totalorder %s507_s15, %s754_s1 }
  0x18   :  { %p513_p10 = pnand %p511_p9, %p508_p8 }
  0x1a   :  { %516 = shalt.err (!%p513_p10)
}
  0x1b   :  { %s517_s20 = scalar_lea.vmem %s34_s12, 256  ;;  %p522_p12 = scmp.lt.s32.totalorder %s34_s12, %s34_s12 }
  0x1c   :  { %p518_p11 = scmp.ne.s32.totalorder %s34_s12, %s517_s20  ;;  %p523_p13 = scmp.lt.s32.totalorder %s517_s20, %s517_s20 }
  0x1e   :  { %p524_p0 = por %p523_p13, %p522_p12 }
  0x20   :  { %p525_p1 = pnand %p524_p0, %p518_p11 }
  0x22   :  { %528 = shalt.err (!%p525_p1)
}
  0x23   :  { %s607_s0 = smov 64   ;;  %s608_s21 = smov 4  }
  0x24   :  { %39 = dma.hbm_to_vmem [thread:$0]  %s754_s1, 256, %s34_s12, [#allocation6], %s607_s0, %s607_s0, %s608_s21  }
  0x25   :  { %595 = dma.done.wait [#allocation3], 512  }
  0x26   :  { %596 = vsyncadd [#allocation3], 4294966784 }
  0x27   :  { %597 = dma.done.wait [#allocation6], 256  }
  0x28   :  { %598 = vsyncadd [#allocation6], 4294967040  ;;  %v479_v0 = vld [vmem:[#allocation5] sm:$0xff]   ;;  %v480_v1 = vld [vmem:[#allocation5 + $0x8] sm:$0xff]   ;;  %s609_s24 = smov 96   ;;  %vm80_vm0 = vcmask 261120  }
  0x29   :  { %271 = vrot.lane.b32.xlu0 %v479_v0, %s607_s0  ;;  %v481_v2 = vld [vmem:[#allocation5] sm:$0xff]   ;;  %273 = vrot.lane.b32.xlu1 %v480_v1, %s607_s0  ;;  %v482_v3 = vld [vmem:[#allocation5 + $0x8] sm:$0xff]   ;;  %v53_v9 = vld [vmem:[#allocation2 + $0x10] sm:$0xff]  ;;  %vm156_vm1 = vcmask 257024   ;;  %s610_s26 = smov [#allocation7]  }
  0x2a   :  { %v483_v4 = vld [vmem:[#allocation5] sm:$0xff]   ;;  %v484_v5 = vld [vmem:[#allocation5 + $0x8] sm:$0xff]   ;;  %v54_v10 = vld [vmem:[#allocation2 + $0x18] sm:$0xff]  ;;  %s351_s27 = sshll.u32 %s610_s26, 4  ;;  %s352_s27 = int_to_ptr.vmem [resolvable:$true] %s351_s27 }
  0x2b   :  { %445 = vmatprep.subr.bf16.mxu0 %v483_v4  ;;  %v51_v6 = vld [vmem:[#allocation2] sm:$0xff]  ;;  %v52_v7 = vld [vmem:[#allocation2 + $0x8] sm:$0xff]  ;;  %v56_v11 = vpack.c.bf16 %v54_v10, %v53_v9  ;;  %p534_p3 = scmp.lt.s32.totalorder %s352_s27, %s352_s27 }
  0x2c   :  { %446 = vmatpush3.bf16.msra.mxu0 %v483_v4  ;;  %v55_v8 = vpack.c.bf16 %v52_v7, %v51_v6  ;;  %v395_v16 = vld [vmem:[%s755_s2] ss:$0 sm:$0xff]  ;;  %s529_s2 = scalar_lea.vmem %s352_s27, 256 }
  0x2d   :  { %175 = vrot.lane.b32.xlu0 %v481_v2, %s609_s24  ;;  %177 = vrot.lane.b32.xlu1 %v482_v3, %s609_s24  ;;  %p530_p2 = scmp.ne.s32.totalorder %s352_s27, %s529_s2  ;;  %p535_p4 = scmp.lt.s32.totalorder %s529_s2, %s529_s2 }
  0x2e   :  { %447 = vmatprep.subr.bf16.mxu0 %v484_v5  ;;  %449 = vmatprep.mubr.msk.bf16.mxu0 %vm80_vm0, %v55_v8 }
  0x2f   :  { %457 = vmatprep.mubr.msk.bf16.mxu1 %vm80_vm0, %v55_v8  ;;  %p536_p5 = por %p535_p4, %p534_p3 }
  0x30   :  { %448 = vmatpush3.bf16.msra.mxu0 %v484_v5 }
  0x31   :  { %p537_p6 = pnand %p536_p5, %p530_p2 }
  0x33   :  { %450 = vmatmul.mubr.msk.bf16.vlgmr.msra.gmra.mrb[0].mxu0 %vm80_vm0, %v56_v11 }
  0x34   :  { %465 = vmatprep.mubr.msk.bf16.mxu0 %vm80_vm0, %v55_v8 }
  0x9b   :  { %v272_v12 = vpop.permute.xlu0 %271  ;;  %v274_v13 = vpop.permute.xlu1 %273 }
  0x9c   :  { %461 = vmatprep.subr.bf16.mxu0 %v272_v12 }
  0x9d   :  { %462 = vmatpush3.bf16.msra.mxu0 %v272_v12 }
  0x9e   :  { %463 = vmatprep.subr.bf16.mxu0 %v274_v13 }
  0x9f   :  { %v176_v14 = vpop.permute.xlu0 %175  ;;  %v178_v15 = vpop.permute.xlu1 %177 }
  0xa0   :  { %453 = vmatprep.subr.bf16.mxu1 %v176_v14 }
  0xa1   :  { %454 = vmatpush3.bf16.msra.mxu1 %v176_v14  ;;  %464 = vmatpush3.bf16.msra.mxu0 %v274_v13 }
  0xa2   :  { %455 = vmatprep.subr.bf16.mxu1 %v178_v15 }
  0xa4   :  { %466 = vmatmul.mubr.msk.bf16.vlgmr.msra.gmra.mrb[4].mxu0 %vm80_vm0, %v56_v11 }
  0xa5   :  { %456 = vmatpush3.bf16.msra.mxu1 %v178_v15 }
  0xa8   :  { %458 = vmatmul.mubr.msk.bf16.vlgmr.msra.gmra.mrb[0].mxu1 %vm80_vm0, %v56_v11 }
 0x106   :  { %v451_v17 = vpop.f32.mrb[0].mxu0 }
 0x107   :  { %v130_v18 = vadd.f32 %v451_v17, %v395_v16  ;;  %v121_v19 = vpop.f32.mrb[1].mxu0 }
 0x108   :  { %v122_v20 = vadd.f32 %v395_v16, %v121_v19  ;;  %v452_v21 = vpop.f32.mrb[2].mxu0 }
 0x109   :  { %v138_v22 = vmul.f32 0.35355338, %v130_v18  ;;  %v133_v23 = vadd.f32 %v452_v21, %v395_v16  ;;  %v124_v24 = vpop.f32.mrb[3].mxu0 }
 0x10a   :  { %v136_v25 = vmul.f32 0.35355338, %v122_v20  ;;  %v125_v26 = vadd.f32 %v395_v16, %v124_v24 }
 0x10b   :  { %v423_v27 = vpack.c.bf16 %v138_v22, %v138_v22  ;;  %v139_v28 = vmul.f32 0.35355338, %v133_v23 }
 0x10c   :  { %v421_v29 = vpack.c.bf16 %v136_v25, %v136_v25  ;;  %v137_v30 = vmul.f32 0.35355338, %v125_v26 }
 0x10d   :  { %159 = vst.msk [vmem:[#allocation7 + $0x8] sm:$0xf] %vm156_vm1, %v423_v27  ;;  %v424_v31 = vpack.c.bf16 %v139_v28, %v139_v28 }
 0x10e   :  { %157 = vst.msk [vmem:[#allocation7] sm:$0xf] %vm156_vm1, %v421_v29  ;;  %v422_v32 = vpack.c.bf16 %v137_v30, %v137_v30 }
 0x10f   :  { %160 = vst.msk [vmem:[#allocation7 + $0xc] sm:$0xf] %vm156_vm1, %v424_v31 }
 0x110   :  { %158 = vst.msk [vmem:[#allocation7 + $0x4] sm:$0xf] %vm156_vm1, %v422_v32 }
 0x111   :  { %540 = shalt.err (!%p537_p6)
}
 0x112   :  { %s541_s30 = scalar_lea.hbm %s757_s4, 256 }
 0x113   :  { %p542_p7 = scmp.ne.s32.totalorder %s757_s4, %s541_s30  ;;  %p545_p8 = scmp.lt.u32.totalorder %s541_s30, %s757_s4 }
 0x115   :  { %p547_p9 = pnand %p545_p8, %p542_p7 }
 0x117   :  { %550 = shalt.err (!%p547_p9)
}
 0x118   :  { %357 = dma.vmem_to_hbm [thread:$0]  %s352_s27, 256, %s757_s4, [#allocation4], %s607_s0, %s607_s0, %s608_s21  }
 0x119   :  { %v412_v33 = vld [vmem:[%s756_s3] ss:$0 sm:$0xff]  ;;  %s611_s4 = smov [#allocation8]   ;;  %s612_s3 = smov [#allocation10]  }
 0x11a   :  { %s363_s15 = sshll.u32 %s611_s4, 4  ;;  %s375_s16 = sshll.u32 %s612_s3, 4  ;;  %s364_s15 = int_to_ptr.vmem [resolvable:$true] %s363_s15  ;;  %s715_s16 = int_to_ptr.vmem [resolvable:$true] %s375_s16 }
 0x11b   :  { %s551_s17 = scalar_lea.vmem %s364_s15, 256  ;;  %p556_p11 = scmp.lt.s32.totalorder %s364_s15, %s364_s15 }
 0x11c   :  { %p552_p10 = scmp.ne.s32.totalorder %s364_s15, %s551_s17  ;;  %p557_p12 = scmp.lt.s32.totalorder %s551_s17, %s551_s17 }
 0x11e   :  { %p558_p13 = por %p557_p12, %p556_p11 }
 0x120   :  { %p559_p0 = pnand %p558_p13, %p552_p10 }
 0x177   :  { %v467_v34 = vpop.f32.mrb[4].mxu0 }
 0x178   :  { %v320_v35 = vadd.f32 %v467_v34, %v412_v33  ;;  %v311_v36 = vpop.f32.mrb[5].mxu0 }
 0x179   :  { %v312_v37 = vadd.f32 %v412_v33, %v311_v36  ;;  %v468_v38 = vpop.f32.mrb[6].mxu0 }
 0x17a   :  { %v431_v39 = vpack.c.bf16 %v320_v35, %v320_v35  ;;  %v323_v40 = vadd.f32 %v468_v38, %v412_v33  ;;  %v314_v41 = vpop.f32.mrb[7].mxu0 }
 0x17b   :  { %v429_v42 = vpack.c.bf16 %v312_v37, %v312_v37  ;;  %v315_v43 = vadd.f32 %v412_v33, %v314_v41  ;;  %v459_v44 = vpop.f32.mrb[0].mxu1 }
 0x17c   :  { %344 = vst.msk [vmem:[#allocation10 + $0x8] sm:$0xf] %vm156_vm1, %v431_v39  ;;  %v432_v45 = vpack.c.bf16 %v323_v40, %v323_v40  ;;  %v427_v46 = vpack.c.bf16 %v459_v44, %v459_v44  ;;  %v215_v47 = vpop.f32.mrb[1].mxu1 }
 0x17d   :  { %342 = vst.msk [vmem:[#allocation10] sm:$0xf] %vm156_vm1, %v429_v42  ;;  %v430_v48 = vpack.c.bf16 %v315_v43, %v315_v43  ;;  %v425_v49 = vpack.c.bf16 %v215_v47, %v215_v47  ;;  %v460_v50 = vpop.f32.mrb[2].mxu1 }
 0x17e   :  { %345 = vst.msk [vmem:[#allocation10 + $0xc] sm:$0xf] %vm156_vm1, %v432_v45  ;;  %248 = vst.msk [vmem:[#allocation8 + $0x8] sm:$0xf] %vm156_vm1, %v427_v46  ;;  %v428_v51 = vpack.c.bf16 %v460_v50, %v460_v50  ;;  %v218_v52 = vpop.f32.mrb[3].mxu1 }
 0x17f   :  { %343 = vst.msk [vmem:[#allocation10 + $0x4] sm:$0xf] %vm156_vm1, %v430_v48  ;;  %246 = vst.msk [vmem:[#allocation8] sm:$0xf] %vm156_vm1, %v425_v49  ;;  %v426_v53 = vpack.c.bf16 %v218_v52, %v218_v52 }
 0x180   :  { %249 = vst.msk [vmem:[#allocation8 + $0xc] sm:$0xf] %vm156_vm1, %v428_v51 }
 0x181   :  { %247 = vst.msk [vmem:[#allocation8 + $0x4] sm:$0xf] %vm156_vm1, %v426_v53 }
 0x182   :  { %562 = shalt.err (!%p559_p0)
}
 0x183   :  { %s563_s20 = scalar_lea.hbm %s758_s5, 256 }
 0x184   :  { %p564_p1 = scmp.ne.s32.totalorder %s758_s5, %s563_s20  ;;  %p567_p2 = scmp.lt.u32.totalorder %s563_s20, %s758_s5 }
 0x186   :  { %p569_p3 = pnand %p567_p2, %p564_p1 }
 0x188   :  { %572 = shalt.err (!%p569_p3)
}
 0x189   :  { %369 = dma.vmem_to_hbm [thread:$0]  %s364_s15, 256, %s758_s5, [#allocation9], %s607_s0, %s607_s0, %s608_s21  }
 0x18a   :  { %s573_s27 = scalar_lea.vmem %s715_s16, 256  ;;  %p578_p5 = scmp.lt.s32.totalorder %s715_s16, %s715_s16 }
 0x18b   :  { %p574_p4 = scmp.ne.s32.totalorder %s715_s16, %s573_s27  ;;  %p579_p6 = scmp.lt.s32.totalorder %s573_s27, %s573_s27 }
 0x18d   :  { %p580_p7 = por %p579_p6, %p578_p5 }
 0x18f   :  { %p581_p8 = pnand %p580_p7, %p574_p4 }
 0x191   :  { %584 = shalt.err (!%p581_p8)
}
 0x192   :  { %s585_s29 = scalar_lea.hbm %s759_s6, 256 }
 0x193   :  { %p586_p9 = scmp.ne.s32.totalorder %s759_s6, %s585_s29  ;;  %p589_p10 = scmp.lt.u32.totalorder %s585_s29, %s759_s6 }
 0x195   :  { %p591_p11 = pnand %p589_p10, %p586_p9 }
 0x197   :  { %594 = shalt.err (!%p591_p11)
}
 0x198   :  { %381 = dma.vmem_to_hbm [thread:$0]  %s715_s16, 256, %s759_s6, [#allocation9], %s607_s0, %s607_s0, %s608_s21  }
 0x199   :  { %599 = dma.done.wait [#allocation4], 256  }
 0x19a   :  { %600 = vsyncadd [#allocation4], 4294967040 }
 0x19b   :  { %601 = dma.done.wait [#allocation9], 512  }
 0x19c   :  { %602 = vsyncadd [#allocation9], 4294966784 }
 0x19d   :  { %391 = vsyncpa [#allocation3], 1 }
 0x19e   :  { %392 = vsyncpa [#allocation6], 1 }
 0x19f   :  { %393 = vsyncpa [#allocation4], 1 }
 0x1a0   :  { %394 = vsyncpa [#allocation9], 1 }

</bundles_post_ra>
